<compile_context>
chip_gen: v5e
topology: v5e:2x2
jax: 0.10.0
libtpu: 0.0.40
codegen_flags: <defaults>
</compile_context>

<pallas_src>
import jax
import jax.numpy as jnp
from jax.experimental import pallas as pl
from jax.experimental.pallas import tpu as pltpu

GAMMA = 2.0          # module's gamma (== 2.0, so pow -> square)
MINI = 1e-7

TILE_R = 8           # sublane rows per tile
MAX_TILE_L = 16384   # lanes per tile: 8 * 16384 * 4 B = 512 KiB per input tile


def _lbp_loss_kernel(pred_ref, label_ref, out_ref):
    # pred_ref/label_ref: (TILE_R, TILE_L) channel-1 logits / labels in VMEM.
    logits = pred_ref[...].astype(jnp.float32)
    label = label_ref[...].astype(jnp.float32)

    p = jax.nn.sigmoid(logits)                       # EUP
    one_minus_p = 1.0 - p
    is_pos = label == 1.0

    q = jnp.where(is_pos, one_minus_p, p)            # focal base
    log_arg = jnp.where(is_pos, p, one_minus_p) + MINI
    loss = -jnp.log(log_arg) * (q * q)               # single log; square, not pow
    loss = jnp.where(label != -1.0, loss, 0.0)       # ignore-mask (& padding)

    # Per-sublane-row partial sums, broadcast across 128 lanes so the (8,128)
    # output block is written with a dense, unmasked store.
    row_sums = jnp.sum(loss, axis=1, keepdims=True)            # (TILE_R, 1)
    out_ref[...] = jnp.broadcast_to(row_sums, out_ref.shape)   # (TILE_R, 128)


def _round_up(x, m):
    return ((x + m - 1) // m) * m


def lbp_loss(predictions, labels):
    """predictions, labels: [B, N, C] float arrays. Returns (loss, 0, 0)."""
    B, N, _ = predictions.shape
    total = B * N

    pred_c1 = predictions[:, :, 1].astype(jnp.float32).reshape(-1)
    label_c1 = labels[:, :, 1].astype(jnp.float32).reshape(-1)

    # Lane-dense tiling: (TILE_R, tile_l) blocks, tile_l a multiple of 128.
    tile_l = min(_round_up(pl.cdiv(total, TILE_R), 128), MAX_TILE_L)
    tile_elems = TILE_R * tile_l
    num_tiles = pl.cdiv(total, tile_elems)
    padded = num_tiles * tile_elems
    pad = padded - total

    # Padded positions carry label = -1 -> masked out; divisor stays B*N.
    pred2d = jnp.pad(pred_c1, (0, pad)).reshape(num_tiles * TILE_R, tile_l)
    label2d = jnp.pad(label_c1, (0, pad), constant_values=-1.0).reshape(
        num_tiles * TILE_R, tile_l)

    partials = pl.pallas_call(
        _lbp_loss_kernel,
        out_shape=jax.ShapeDtypeStruct((num_tiles * TILE_R, 128), jnp.float32),
        grid=(num_tiles,),
        in_specs=[
            pl.BlockSpec((TILE_R, tile_l), lambda i: (i, 0)),
            pl.BlockSpec((TILE_R, tile_l), lambda i: (i, 0)),
        ],
        out_specs=pl.BlockSpec((TILE_R, 128), lambda i: (i, 0)),
        compiler_params=pltpu.CompilerParams(
            dimension_semantics=("parallel",),
            allow_input_fusion=[True, True],
        ),
    )(pred2d, label2d)

    # Global sum / (B*N) == mean over N then mean over B (equal-length rows).
    loss = jnp.sum(partials[:, 0]) / jnp.float32(total)
    zero = jnp.array(0, dtype=jnp.int32)
    return loss, zero, zero


def _reference(predictions, labels):
    # Pure-JAX transcription of the PyTorch forward (for sanity check).
    p = jax.nn.sigmoid(predictions[:, :, 1])
    y = labels[:, :, 1]
    focal = jnp.power(jnp.where(y == 1.0, 1.0 - p, p), GAMMA)
    loss = -(y * jnp.log(p + MINI) + (1.0 - y) * jnp.log(1.0 - p + MINI)) * focal
    loss = jnp.where(y != -1.0, loss, 0.0)
    return jnp.mean(jnp.mean(loss, axis=1))


if __name__ == "__main__":
    # Small shapes consistent with the forward: [batch, num_cells, channels]
    B, N, C = 2, 16, 4
    key = jax.random.PRNGKey(0)
    k_pred, k_lab = jax.random.split(key)

    predictions = jax.random.normal(k_pred, (B, N, C), dtype=jnp.float32)

    # Labels: channel 1 drawn from {-1, 0, 1} (ignore / negative / positive)
    lab_cat = jax.random.randint(k_lab, (B, N, C), minval=0, maxval=3)
    labels = lab_cat.astype(jnp.float32) - 1.0

    loss, z0, z1 = lbp_loss(predictions, labels)
    loss = jax.block_until_ready(loss)

    ref = _reference(predictions, labels)
    assert jnp.allclose(loss, ref, rtol=1e-5, atol=1e-5), (loss, ref)

    print("KERNEL_OK")
</pallas_src>

<mosaic_0001>
module attributes {stable_mosaic.version = 11 : i64} {
  func.func @_lbp_loss_kernel(%arg0: i32, %arg1: memref<8x128xf32, #tpu.memory_space<vmem>>, %arg2: memref<8x128xf32, #tpu.memory_space<vmem>>, %arg3: memref<8x128xf32, #tpu.memory_space<vmem>>) attributes {dimension_semantics = [#tpu.dimension_semantics<parallel>], iteration_bounds = array<i64: 1>, scalar_prefetch = 0 : i64, scratch_operands = 0 : i64, tpu.core_type = #tpu.core_type<tc>, window_params = [{transform_indices = @transform_0, window_bounds = array<i64: 8, 128>}, {transform_indices = @transform_1, window_bounds = array<i64: 8, 128>}, {transform_indices = @transform_2, window_bounds = array<i64: 8, 128>}]} {
    %c0 = arith.constant 0 : index
    %c0_0 = arith.constant 0 : index
    %0 = vector.load %arg1[%c0, %c0_0] : memref<8x128xf32, #tpu.memory_space<vmem>>, vector<8x128xf32>
    %c0_1 = arith.constant 0 : index
    %c0_2 = arith.constant 0 : index
    %1 = vector.load %arg2[%c0_1, %c0_2] : memref<8x128xf32, #tpu.memory_space<vmem>>, vector<8x128xf32>
    %2 = arith.negf %0 : vector<8x128xf32>
    %3 = math.exp %2 : vector<8x128xf32>
    %cst = arith.constant 1.000000e+00 : f32
    %4 = vector.broadcast %cst : f32 to vector<8x128xf32>
    %5 = arith.addf %4, %3 : vector<8x128xf32>
    %6 = arith.divf %4, %5 : vector<8x128xf32>
    %cst_3 = arith.constant 1.000000e+00 : f32
    %7 = vector.broadcast %cst_3 : f32 to vector<8x128xf32>
    %8 = arith.subf %7, %6 : vector<8x128xf32>
    %cst_4 = arith.constant 1.000000e+00 : f32
    %9 = vector.broadcast %cst_4 : f32 to vector<8x128xf32>
    %10 = arith.cmpf oeq, %1, %9 : vector<8x128xf32>
    %11 = arith.select %10, %8, %6 : vector<8x128xi1>, vector<8x128xf32>
    %12 = arith.select %10, %6, %8 : vector<8x128xi1>, vector<8x128xf32>
    %cst_5 = arith.constant 1.000000e-07 : f32
    %13 = vector.broadcast %cst_5 : f32 to vector<8x128xf32>
    %14 = arith.addf %12, %13 : vector<8x128xf32>
    %15 = math.log %14 : vector<8x128xf32>
    %cst_6 = arith.constant 0.000000e+00 : f32
    %16 = vector.broadcast %cst_6 : f32 to vector<8x128xf32>
    %17 = arith.subf %16, %15 : vector<8x128xf32>
    %18 = arith.mulf %11, %11 : vector<8x128xf32>
    %19 = arith.mulf %17, %18 : vector<8x128xf32>
    %cst_7 = arith.constant -1.000000e+00 : f32
    %20 = vector.broadcast %cst_7 : f32 to vector<8x128xf32>
    %21 = arith.cmpf one, %1, %20 : vector<8x128xf32>
    %cst_8 = arith.constant 0.000000e+00 : f32
    %22 = vector.broadcast %cst_8 : f32 to vector<8x128xf32>
    %23 = arith.select %21, %19, %22 : vector<8x128xi1>, vector<8x128xf32>
    %cst_9 = arith.constant dense<0.000000e+00> : vector<8xf32>
    %24 = vector.multi_reduction <add>, %23, %cst_9 [1] : vector<8x128xf32> to vector<8xf32>
    %25 = vector.shape_cast %24 : vector<8xf32> to vector<8x1xf32>
    %26 = vector.shape_cast %25 : vector<8x1xf32> to vector<8x1xf32>
    %27 = vector.broadcast %26 : vector<8x1xf32> to vector<8x128xf32>
    %c0_10 = arith.constant 0 : index
    %c0_11 = arith.constant 0 : index
    %28 = vector.load %arg3[%c0_10, %c0_11] : memref<8x128xf32, #tpu.memory_space<vmem>>, vector<8x128xf32>
    tpu.vector_store %arg3[%c0_10, %c0_11], %27 {strides = array<i32>} : memref<8x128xf32, #tpu.memory_space<vmem>>, vector<8x128xf32>,
    return
  }
  func.func @transform_0(%arg0: i32) -> (i32, i32) {
    %c0_i32 = arith.constant 0 : i32
    %c0_i32_0 = arith.constant 0 : i32
    return %arg0, %c0_i32 : i32, i32
  }
  func.func @transform_1(%arg0: i32) -> (i32, i32) {
    %c0_i32 = arith.constant 0 : i32
    %c0_i32_0 = arith.constant 0 : i32
    return %arg0, %c0_i32 : i32, i32
  }
  func.func @transform_2(%arg0: i32) -> (i32, i32) {
    %c0_i32 = arith.constant 0 : i32
    %c0_i32_0 = arith.constant 0 : i32
    return %arg0, %c0_i32 : i32, i32
  }
}

</mosaic_0001>

<bundles_post_ra>
// kernel: tpu_custom_call.1
= control target key start
LH: loop header
LB: loop body
LE: loop exit
PB: predicated region body
PF: predicated region fallthrough
CT: control target
= control target key end

     0   :  { %7 = vsyncpa [#allocation3], 0  ;;  %s209_s0 = inlined_call_operand.hbm [shape: f32[8,128], index: 0, kind: input, shape index: {}]   ;;  %s210_s1 = inlined_call_operand.hbm [shape: f32[8,128], index: 1, kind: input, shape index: {}]   ;;  %s211_s2 = inlined_call_operand.hbm [shape: f32[8,128], index: 2, kind: output, shape index: {}]  }
   0x1   :  { %8 = vsyncpa [#allocation6], 0 }
   0x2   :  { %9 = vsyncpa [#allocation4], 0  ;;  %s15_s11 = sshll.u32 %s209_s0, 4  ;;  %s182_s12 = smov [#allocation2]   ;;  %s16_s11 = int_to_ptr.hbm [resolvable:$true] %s15_s11 }
   0x3   :  { %s17_s13 = sshll.u32 %s182_s12, 4  ;;  %s26_s16 = sshll.u32 %s210_s1, 4  ;;  %s18_s13 = int_to_ptr.vmem [resolvable:$true] %s17_s13  ;;  %s27_s16 = int_to_ptr.hbm [resolvable:$true] %s26_s16 }
   0x4   :  { %20 = dma.hbm_to_vmem [thread:$0]  %s16_s11, 128, %s18_s13, [#allocation3]  }
   0x5   :  { %s183_s17 = smov [#allocation5]  }
   0x6   :  { %s28_s18 = sshll.u32 %s183_s17, 4  ;;  %s29_s18 = int_to_ptr.vmem [resolvable:$true] %s28_s18 }
   0x7   :  { %31 = dma.hbm_to_vmem [thread:$0]  %s27_s16, 128, %s29_s18, [#allocation6]  }
   0x8   :  { %176 = dma.done.wait [#allocation3], 128  }
   0x9   :  { %177 = vsyncadd [#allocation3], 4294967168 }
   0xa   :  { %178 = dma.done.wait [#allocation6], 128  }
   0xb   :  { %179 = vsyncadd [#allocation6], 4294967168  ;;  %v40_v0 = vld [vmem:[#allocation2] sm:$0xff]  ;;  %v41_v11 = vld [vmem:[#allocation5] sm:$0xff]  ;;  %s184_s0 = smov [#allocation7]   ;;  %s83_s21 = sshll.u32 %s211_s2, 4  ;;  %s84_s21 = int_to_ptr.hbm [resolvable:$true] %s83_s21 }
   0xc   :  { %v94_v1 = vmul.f32 -1.442695, %v40_v0  ;;  %vm62_vm4 = vcmp.eq.f32.partialorder %v41_v11, 1.0  ;;  %vm71_vm5 = vcmp.ne.f32.partialorder %v41_v11, -1.0  ;;  %s81_s1 = sshll.u32 %s184_s0, 4  ;;  %s82_s1 = int_to_ptr.vmem [resolvable:$true] %s81_s1 }
   0xe   :  { %98 = vpow2.f32 %v94_v1 }
  0x14   :  { %v99_v2 = vpop.eup %98 }
  0x15   :  { %v45_v3 = vadd.f32 1.0, %v99_v2 }
  0x17   :  { %100 = vrcp.f32 %v45_v3  ;;  %v57_v6 = vand.u32 2147483648, %v45_v3  ;;  %vm51_vm0 = vweird.f32 %v45_v3  ;;  %v55_v8 = vand.u32 2147483647, %v45_v3 }
  0x19   :  { %v58_v10 = vor.u32 1.1754944e-38, %v57_v6  ;;  %vm56_vm3 = vcmp.eq.f32.partialorder %v55_v8, 8.507059e+37 }
  0x1d   :  { %v101_v4 = vpop.eup %100 }
  0x1e   :  { %v47_v5 = vmul.f32 %v101_v4, %v45_v3  ;;  %vm52_vm1 = vweird.f32 %v101_v4 }
  0x1f   :  { %vm53_vm2 = vmor %vm51_vm0, %vm52_vm1 }
  0x20   :  { %v48_v7 = vsub.f32 1.0, %v47_v5 }
  0x22   :  { %v49_v9 = vmul.f32 %v101_v4, %v48_v7 }
  0x24   :  { %v50_v12 = vadd.f32 %v101_v4, %v49_v9 }
  0x26   :  { %v54_v13 = vsel %vm53_vm2, %v101_v4, %v50_v12 }
  0x27   :  { %v59_v14 = vsel %vm56_vm3, %v58_v10, %v54_v13 }
  0x28   :  { %v61_v15 = vsub.f32 1.0, %v59_v14 }
  0x2a   :  { %v64_v16 = vsel %vm62_vm4, %v59_v14, %v61_v15  ;;  %v63_v18 = vsel %vm62_vm4, %v61_v15, %v59_v14 }
  0x2b   :  { %v65_v17 = vadd.f32 1e-07, %v64_v16  ;;  %v69_v21 = vmul.f32 %v63_v18, %v63_v18 }
  0x2d   :  { %102 = vlog2.f32 %v65_v17 }
  0x33   :  { %v103_v19 = vpop.eup %102 }
  0x34   :  { %v67_v20 = vmul.f32 0.6931472, %v103_v19 }
  0x36   :  { %v68_v22 = vsub.f32 0.0, %v67_v20 }
  0x38   :  { %v70_v23 = vmul.f32 %v69_v21, %v68_v22 }
  0x3a   :  { %v72_v24 = vsel %vm71_vm5, %v70_v23, 0.0 }
  0x3b   :  { %73 = vadd.xlane.f32.xlu0 %v72_v24 }
  0xae   :  { %v74_v25 = vpop.xlane.xlu0 %73 }
  0xaf   :  { %75 = vst [vmem:[#allocation7] sm:$0xff] %v74_v25 }
  0xb0   :  { %86 = dma.vmem_to_hbm [thread:$0]  %s82_s1, 128, %s84_s21, [#allocation4]  }
  0xb1   :  { %180 = dma.done.wait [#allocation4], 128  }
  0xb2   :  { %181 = vsyncadd [#allocation4], 4294967168 }
  0xb3   :  { %91 = vsyncpa [#allocation3], 1 }
  0xb4   :  { %92 = vsyncpa [#allocation6], 1 }
  0xb5   :  { %93 = vsyncpa [#allocation4], 1 }

</bundles_post_ra>
